<compile_context>
chip_gen: v6e
topology: v6e:2x2x1
jax: 0.10.0
libtpu: 0.0.40
codegen_flags: <defaults>
</compile_context>

<pallas_src>
import jax
import jax.numpy as jnp
from jax.experimental import pallas as pl
from jax.experimental.pallas import tpu as pltpu

SEQ = 50
ACOUSTIC_DIM = 74
VISUAL_DIM = 47
K = SEQ * ACOUSTIC_DIM  # 3700


def _head_kernel(x_ref, w_ref, b_ref, o_ref):
    # x_ref: (TB, 50, 74) VMEM        (acoustic block)
    # w_ref: (1, 50, 74) f32 VMEM     (resident weight)
    # b_ref: (1,) f32 SMEM            (scalar bias)
    # o_ref: (TB, 1, 1) f32 VMEM
    x = x_ref[...].astype(jnp.float32)
    prod = x * w_ref[...]                         # VPU; weight broadcasts over batch (major) dim
    s = jnp.sum(prod, axis=2, keepdims=True)      # XLU lane reduce    -> (TB, 50, 1)
    s = jnp.sum(s, axis=1, keepdims=True)         # XLU sublane reduce -> (TB, 1, 1)
    o_ref[...] = s + b_ref[0]                     # scalar bias folds into VPU epilogue


def head_linear(acoustic, weight, bias, *, block_b=256):
    """acoustic: (B, 50, 74) float, weight: (1, 50, 74) f32, bias: (1,) f32 -> (B, 1) f32."""
    B = acoustic.shape[0]
    tb = min(block_b, B)
    grid = (pl.cdiv(B, tb),)
    out3 = pl.pallas_call(
        _head_kernel,
        out_shape=jax.ShapeDtypeStruct((B, 1, 1), jnp.float32),
        grid=grid,
        in_specs=[
            pl.BlockSpec((tb, SEQ, ACOUSTIC_DIM), lambda i: (i, 0, 0)),
            pl.BlockSpec((1, SEQ, ACOUSTIC_DIM), lambda i: (0, 0, 0)),   # resident weight
            pl.BlockSpec(memory_space=pltpu.MemorySpace.SMEM),            # scalar bias
        ],
        out_specs=pl.BlockSpec((tb, 1, 1), lambda i: (i, 0, 0)),
        compiler_params=pltpu.CompilerParams(
            dimension_semantics=("parallel",)),
        cost_estimate=pl.CostEstimate(
            flops=2 * B * K,
            transcendentals=0,
            bytes_accessed=int(acoustic.size * acoustic.dtype.itemsize) + 4 * (K + 1 + B)),
    )(acoustic, weight, bias)
    return out3.reshape(B, 1)


def head_forward(params, input_ids, visual, acoustic, token_type_ids,
                 attention_mask, labels=None):
    """Mirrors Head.forward: returns (linear(acoustic.view(B, -1)), visual)."""
    out = head_linear(acoustic, params["weight"], params["bias"])
    return out, visual


def init_head_params(key):
    # nn.Linear(3700, 1): weight (1, 3700), bias (1,), uniform(-1/sqrt(K), 1/sqrt(K)).
    kw, kb = jax.random.split(key)
    bound = 1.0 / jnp.sqrt(jnp.float32(K))
    w = jax.random.uniform(kw, (1, K), jnp.float32, minval=-bound, maxval=bound)
    b = jax.random.uniform(kb, (1,), jnp.float32, minval=-bound, maxval=bound)
    # Store the weight row-major-reshaped to (1, 50, 74): Wr[0, s, d] == W[0, s*74 + d],
    # matching torch's .view(B, -1) flatten of a contiguous (B, 50, 74) tensor.
    return {"weight": w.reshape(1, SEQ, ACOUSTIC_DIM), "bias": b}


if __name__ == "__main__":
    key = jax.random.PRNGKey(0)
    k_param, k_vis, k_ac, k_ids = jax.random.split(key, 4)

    B = 2
    params = init_head_params(k_param)

    input_ids = jax.random.randint(k_ids, (B, SEQ), 0, 100, dtype=jnp.int32)
    token_type_ids = jnp.zeros((B, SEQ), dtype=jnp.int32)
    attention_mask = jnp.ones((B, SEQ), dtype=jnp.int32)
    visual = jax.random.normal(k_vis, (B, SEQ, VISUAL_DIM), dtype=jnp.float32)
    acoustic = jax.random.normal(k_ac, (B, SEQ, ACOUSTIC_DIM), dtype=jnp.float32)

    out, vis_out = head_forward(params, input_ids, visual, acoustic,
                                token_type_ids, attention_mask)
    out = jax.block_until_ready(out)
    vis_out = jax.block_until_ready(vis_out)

    # Sanity check against plain-JAX reference of the torch semantics.
    ref = acoustic.reshape(B, -1) @ params["weight"].reshape(1, K).T + params["bias"]
    assert out.shape == (B, 1)
    assert jnp.allclose(out, ref, atol=1e-4, rtol=1e-4)
    assert vis_out.shape == (B, SEQ, VISUAL_DIM)

    print("KERNEL_OK")
</pallas_src>

<mosaic_0001>
module attributes {stable_mosaic.version = 11 : i64} {
  func.func @_head_kernel(%arg0: i32, %arg1: memref<2x50x74xf32, #tpu.memory_space<vmem>>, %arg2: memref<1x50x74xf32, #tpu.memory_space<vmem>>, %arg3: memref<1xf32, #tpu.memory_space<smem>>, %arg4: memref<2x1x1xf32, #tpu.memory_space<vmem>>) attributes {dimension_semantics = [#tpu.dimension_semantics<parallel>], iteration_bounds = array<i64: 1>, scalar_prefetch = 0 : i64, scratch_operands = 0 : i64, tpu.core_type = #tpu.core_type<tc>, window_params = [{transform_indices = @transform_0, window_bounds = array<i64: 2, 50, 74>}, {pipeline_mode = #tpu.pipeline_mode<synchronous>, transform_indices = @transform_1, window_bounds = array<i64: 1, 50, 74>}, {transform_indices = @transform_2, window_bounds = array<i64: 1>}, {transform_indices = @transform_3, window_bounds = array<i64: 2, 1, 1>}]} {
    %c0 = arith.constant 0 : index
    %c0_0 = arith.constant 0 : index
    %c0_1 = arith.constant 0 : index
    %0 = vector.load %arg1[%c0, %c0_0, %c0_1] : memref<2x50x74xf32, #tpu.memory_space<vmem>>, vector<2x50x74xf32>
    %c0_2 = arith.constant 0 : index
    %c0_3 = arith.constant 0 : index
    %c0_4 = arith.constant 0 : index
    %1 = vector.load %arg2[%c0_2, %c0_3, %c0_4] : memref<1x50x74xf32, #tpu.memory_space<vmem>>, vector<1x50x74xf32>
    %2 = vector.broadcast %1 : vector<1x50x74xf32> to vector<2x50x74xf32>
    %3 = arith.mulf %0, %2 : vector<2x50x74xf32>
    %cst = arith.constant dense<0.000000e+00> : vector<2x50xf32>
    %4 = vector.multi_reduction <add>, %3, %cst [2] : vector<2x50x74xf32> to vector<2x50xf32>
    %5 = vector.shape_cast %4 : vector<2x50xf32> to vector<2x50x1xf32>
    %cst_5 = arith.constant dense<0.000000e+00> : vector<2x1xf32>
    %6 = vector.multi_reduction <add>, %5, %cst_5 [1] : vector<2x50x1xf32> to vector<2x1xf32>
    %7 = vector.shape_cast %6 : vector<2x1xf32> to vector<2x1x1xf32>
    %c0_6 = arith.constant 0 : index
    %8 = memref.load %arg3[%c0_6] : memref<1xf32, #tpu.memory_space<smem>>
    %9 = vector.broadcast %8 : f32 to vector<2x1x1xf32>
    %10 = arith.addf %7, %9 : vector<2x1x1xf32>
    %c0_7 = arith.constant 0 : index
    %c0_8 = arith.constant 0 : index
    %c0_9 = arith.constant 0 : index
    %11 = vector.load %arg4[%c0_7, %c0_8, %c0_9] : memref<2x1x1xf32, #tpu.memory_space<vmem>>, vector<2x1x1xf32>
    tpu.vector_store %arg4[%c0_7, %c0_8, %c0_9], %10 {strides = array<i32>} : memref<2x1x1xf32, #tpu.memory_space<vmem>>, vector<2x1x1xf32>,
    return
  }
  func.func @transform_0(%arg0: i32) -> (i32, i32, i32) {
    %c0_i32 = arith.constant 0 : i32
    %c0_i32_0 = arith.constant 0 : i32
    %c0_i32_1 = arith.constant 0 : i32
    return %arg0, %c0_i32, %c0_i32_0 : i32, i32, i32
  }
  func.func @transform_1(%arg0: i32) -> (i32, i32, i32) {
    %c0_i32 = arith.constant 0 : i32
    %c0_i32_0 = arith.constant 0 : i32
    %c0_i32_1 = arith.constant 0 : i32
    %c0_i32_2 = arith.constant 0 : i32
    return %c0_i32, %c0_i32_0, %c0_i32_1 : i32, i32, i32
  }
  func.func @transform_2(%arg0: i32) -> i32 {
    %c0_i32 = arith.constant 0 : i32
    %c0_i32_0 = arith.constant 0 : i32
    return %c0_i32 : i32
  }
  func.func @transform_3(%arg0: i32) -> (i32, i32, i32) {
    %c0_i32 = arith.constant 0 : i32
    %c0_i32_0 = arith.constant 0 : i32
    %c0_i32_1 = arith.constant 0 : i32
    return %arg0, %c0_i32, %c0_i32_0 : i32, i32, i32
  }
}

</mosaic_0001>

<bundles_post_ra>
// kernel: tpu_custom_call.1
= control target key start
LH: loop header
LB: loop body
LE: loop exit
PB: predicated region body
PF: predicated region fallthrough
CT: control target
= control target key end

     0   :  { %vm50_vm0 = vcmask 605184   ;;  %vm69_vm1 = vcmask 599040   ;;  %vm99_vm2 = vcmask 1041408   ;;  %vm125_vm3 = vcmask 0   ;;  %s236_s0 = inlined_call_operand.vmem [shape: f32[2,50,74], index: 0, kind: input, shape index: {}]   ;;  %s237_s1 = inlined_call_operand.vmem [shape: f32[1,50,74], index: 1, kind: input, shape index: {}]   ;;  %s238_s2 = inlined_call_operand.<no memory space> [shape: f32[1], index: 2, kind: input, shape index: {}]   ;;  %s239_s3 = inlined_call_operand.vmem [shape: f32[2,1,1], index: 3, kind: output, shape index: {}]  }
   0x1   :  { %v22_v0 = vld [vmem:[%s236_s0 + $0x38] sm:$0xff]  ;;  %v29_v1 = vld [vmem:[%s237_s1] sm:$0xff]  ;;  %v30_v6 = vld [vmem:[%s237_s1 + $0x8] sm:$0xff] }
   0x2   :  { %v15_v2 = vld [vmem:[%s236_s0] sm:$0xff]  ;;  %v43_v3 = vmul.f32 %v29_v1, %v22_v0  ;;  %v16_v7 = vld [vmem:[%s236_s0 + $0x8] sm:$0xff]  ;;  %v31_v11 = vld [vmem:[%s237_s1 + $0x10] sm:$0xff] }
   0x3   :  { %v36_v4 = vmul.f32 %v29_v1, %v15_v2  ;;  %v23_v5 = vld [vmem:[%s236_s0 + $0x40] sm:$0xff]  ;;  %v37_v9 = vmul.f32 %v30_v6, %v16_v7  ;;  %v24_v10 = vld [vmem:[%s236_s0 + $0x48] sm:$0xff]  ;;  %v17_v12 = vld [vmem:[%s236_s0 + $0x10] sm:$0xff] }
   0x4   :  { %v44_v8 = vmul.f32 %v30_v6, %v23_v5  ;;  %v73_v13 = vsel %vm50_vm0, %v43_v3, 0.0  ;;  %v45_v17 = vmul.f32 %v31_v11, %v24_v10  ;;  %v38_v18 = vmul.f32 %v31_v11, %v17_v12  ;;  %v25_v19 = vld [vmem:[%s236_s0 + $0x50] sm:$0xff]  ;;  %v32_v20 = vld [vmem:[%s237_s1 + $0x18] sm:$0xff]  ;;  %v33_v27 = vld [vmem:[%s237_s1 + $0x20] sm:$0xff] }
   0x5   :  { %v51_v14 = vsel %vm50_vm0, %v36_v4, 0.0  ;;  %74 = vadd.xlane.f32.xlu1 %v73_v13  ;;  %v54_v16 = vsel %vm50_vm0, %v37_v9, 0.0  ;;  %v18_v21 = vld [vmem:[%s236_s0 + $0x18] sm:$0xff]  ;;  %v46_v24 = vmul.f32 %v32_v20, %v25_v19  ;;  %v19_v28 = vld [vmem:[%s236_s0 + $0x20] sm:$0xff]  ;;  %v34_v34 = vld [vmem:[%s237_s1 + $0x28] sm:$0xff] }
   0x6   :  { %52 = vadd.xlane.f32.xlu0 %v51_v14  ;;  %v76_v15 = vsel %vm50_vm0, %v44_v8, 0.0  ;;  %v79_v22 = vsel %vm50_vm0, %v45_v17, 0.0  ;;  %v57_v23 = vsel %vm50_vm0, %v38_v18, 0.0  ;;  %v39_v25 = vmul.f32 %v32_v20, %v18_v21  ;;  %v26_v26 = vld [vmem:[%s236_s0 + $0x58] sm:$0xff]  ;;  %v27_v33 = vld [vmem:[%s236_s0 + $0x60] sm:$0xff]  ;;  %v20_v35 = vld [vmem:[%s236_s0 + $0x28] sm:$0xff] }
   0x7   :  { %v82_v29 = vsel %vm50_vm0, %v46_v24, 0.0  ;;  %v47_v31 = vmul.f32 %v33_v27, %v26_v26  ;;  %v40_v32 = vmul.f32 %v33_v27, %v19_v28  ;;  %v48_v38 = vmul.f32 %v34_v34, %v27_v33  ;;  %v28_v40 = vld [vmem:[%s236_s0 + $0x68] sm:$0x3]  ;;  %v35_v41 = vld [vmem:[%s237_s1 + $0x30] sm:$0x3] }
   0x8   :  { %v60_v30 = vsel %vm50_vm0, %v39_v25, 0.0  ;;  %v41_v39 = vmul.f32 %v34_v34, %v20_v35  ;;  %v21_v42 = vld [vmem:[%s236_s0 + $0x30] sm:$0x3]  ;;  %v49_v45 = vmul.f32 %v35_v41, %v28_v40 }
   0x9   :  { %77 = vadd.xlane.f32.xlu1 %v76_v15  ;;  %v85_v36 = vsel %vm50_vm0, %v47_v31, 0.0  ;;  %v63_v37 = vsel %vm50_vm0, %v40_v32, 0.0  ;;  %v88_v43 = vsel %vm50_vm0, %v48_v38, 0.0  ;;  %v42_v46 = vmul.f32 %v35_v41, %v21_v42 }
   0xa   :  { %55 = vadd.xlane.f32.xlu0 %v54_v16  ;;  %v66_v44 = vsel %vm50_vm0, %v41_v39, 0.0  ;;  %v91_v47 = vsel %vm69_vm1, %v49_v45, 0.0 }
   0xb   :  { %v70_v48 = vsel %vm69_vm1, %v42_v46, 0.0 }
   0xd   :  { %80 = vadd.xlane.f32.xlu1 %v79_v22 }
   0xe   :  { %58 = vadd.xlane.f32.xlu0 %v57_v23  ;;  %v122_v23 = vstv %s238_s2 }
  0x11   :  { %83 = vadd.xlane.f32.xlu1 %v82_v29 }
  0x12   :  { %61 = vadd.xlane.f32.xlu0 %v60_v30 }
  0x15   :  { %86 = vadd.xlane.f32.xlu1 %v85_v36 }
  0x16   :  { %64 = vadd.xlane.f32.xlu0 %v63_v37 }
  0x19   :  { %89 = vadd.xlane.f32.xlu1 %v88_v43 }
  0x1a   :  { %67 = vadd.xlane.f32.xlu0 %v66_v44 }
  0x1d   :  { %92 = vadd.xlane.f32.xlu1 %v91_v47 }
  0x1e   :  { %71 = vadd.xlane.f32.xlu0 %v70_v48 }
  0x8e   :  { %v75_v49 = vpop.xlane.xlu1 %74 }
  0x8f   :  { %v53_v50 = vpop.xlane.xlu0 %52 }
  0x92   :  { %v78_v51 = vpop.xlane.xlu1 %77 }
  0x93   :  { %v56_v52 = vpop.xlane.xlu0 %55  ;;  %v108_v57 = vadd.f32 %v78_v51, %v75_v49 }
  0x94   :  { %v94_v58 = vadd.f32 %v56_v52, %v53_v50 }
  0x96   :  { %v81_v53 = vpop.xlane.xlu1 %80 }
  0x97   :  { %v59_v54 = vpop.xlane.xlu0 %58  ;;  %v109_v61 = vadd.f32 %v108_v57, %v81_v53 }
  0x98   :  { %v95_v62 = vadd.f32 %v94_v58, %v59_v54 }
  0x9a   :  { %v84_v55 = vpop.xlane.xlu1 %83 }
  0x9b   :  { %v62_v56 = vpop.xlane.xlu0 %61  ;;  %v110_v63 = vadd.f32 %v109_v61, %v84_v55 }
  0x9c   :  { %v96_v0 = vadd.f32 %v95_v62, %v62_v56 }
  0x9e   :  { %v87_v59 = vpop.xlane.xlu1 %86 }
  0x9f   :  { %v65_v60 = vpop.xlane.xlu0 %64  ;;  %v111_v3 = vadd.f32 %v110_v63, %v87_v59 }
  0xa0   :  { %v97_v4 = vadd.f32 %v96_v0, %v65_v60 }
  0xa2   :  { %v90_v1 = vpop.xlane.xlu1 %89 }
  0xa3   :  { %v68_v2 = vpop.xlane.xlu0 %67  ;;  %v112_v5 = vadd.f32 %v111_v3, %v90_v1 }
  0xa4   :  { %v98_v6 = vadd.f32 %v97_v4, %v68_v2 }
  0xa6   :  { %v93_v7 = vpop.xlane.xlu1 %92 }
  0xa7   :  { %v72_v8 = vpop.xlane.xlu0 %71  ;;  %v113_v9 = vsel %vm99_vm2, %v93_v7, 0.0 }
  0xa8   :  { %v100_v10 = vsel %vm99_vm2, %v72_v8, 0.0  ;;  %v114_v11 = vadd.f32 %v113_v9, %v112_v5 }
  0xa9   :  { %v101_v12 = vadd.f32 %v100_v10, %v98_v6 }
  0xaa   :  { %v115_v13 = vrot.slane %v114_v11, 4 }
  0xab   :  { %v102_v14 = vrot.slane %v101_v12, 4 }
  0xac   :  { %v116_v15 = vadd.f32 %v115_v13, %v114_v11 }
  0xad   :  { %v103_v16 = vadd.f32 %v102_v14, %v101_v12 }
  0xae   :  { %v117_v17 = vrot.slane %v116_v15, 2 }
  0xaf   :  { %v104_v18 = vrot.slane %v103_v16, 2 }
  0xb0   :  { %v118_v19 = vadd.f32 %v117_v17, %v116_v15 }
  0xb1   :  { %v105_v20 = vadd.f32 %v104_v18, %v103_v16 }
  0xb2   :  { %v119_v21 = vrot.slane %v118_v19, 1 }
  0xb3   :  { %v106_v22 = vrot.slane %v105_v20, 1 }
  0xb4   :  { %v120_v24 = vadd.f32 %v119_v21, %v118_v19 }
  0xb5   :  { %v107_v25 = vadd.f32 %v106_v22, %v105_v20 }
  0xb6   :  { %v124_v26 = vadd.f32 %v122_v23, %v120_v24 }
  0xb7   :  { %v123_v27 = vadd.f32 %v122_v23, %v107_v25 }
  0xb8   :  { %127 = vst.msk [vmem:[%s239_s3 + $0x1] sm:$0x1] %vm125_vm3, %v124_v26 }
  0xb9   :  { %126 = vst.msk [vmem:[%s239_s3] sm:$0x1] %vm125_vm3, %v123_v27 }

</bundles_post_ra>
